<compile_context>
chip_gen: v7x
topology: tpu7x:2x2x1
jax: 0.10.0
libtpu: 0.0.40
codegen_flags: <defaults>
</compile_context>

<pallas_src>
import functools

import jax
import jax.numpy as jnp
from jax.experimental import pallas as pl
from jax.experimental.pallas import tpu as pltpu

_BIG = 1e30                      # "infinite" squared distance for padded points
_TN_MAX = 512                    # sublane extent of the distance tile
_TM_MAX = 2048                   # lane extent of the distance tile
_RESIDENT_RHS_MAX_BYTES = 8 * 1024 * 1024   # budget (incl. double buffer) for resident rhs


def _round_up(x, m):
    return ((x + m - 1) // m) * m


def _pick_tile(size, cap):
    """Lane-dense tile (multiple of 128, <= cap).  Minimize grid steps first
    (per-step overhead dominates), then padded extent, then prefer larger tiles."""
    best_key, best_t = None, 128
    t = 128
    while t <= cap:
        pad = _round_up(size, t)
        key = (pad // t, pad, -t)
        if best_key is None or key < best_key:
            best_key, best_t = key, t
        t += 128
    return best_t


def _chamfer_kernel(x_ref, yt_ref, d1_ref, d2_ref, d1_acc, *, tm, rhs_resident):
    # x_ref : (1, TN, 8)   lhs features  [x, y, z, |p|^2, 1, 0, 0, 0]
    # yt_ref: (1, 8, Mp)   (resident) or (1, 8, TM) (tiled) rhs features^T
    # d1_ref: (1, 1, TN)   min_j ||p_i - q_j||^2 for this N tile (written once)
    # d2_ref: (1, 1, Mp)   min_i ||p_i - q_j||^2 (resident across the batch step)
    # d1_acc: (TN, 128)    running folded min across M tiles (VMEM scratch)
    n = pl.program_id(1)
    m = pl.program_id(2)
    num_m = pl.num_programs(2)

    off = pl.multiple_of(m * tm, 128)

    x = x_ref[0]                                            # (TN, 8)
    if rhs_resident:
        y = yt_ref[0, :, pl.ds(off, tm)]                    # (8, TM) window of resident rhs
    else:
        y = yt_ref[0]                                       # (8, TM)

    # MXU emits the squared distances directly.  Precision pinned so the folded
    # |p|^2 + |q|^2 - 2 p.q formulation does not suffer bf16-pass cancellation.
    d = jnp.dot(x, y, preferred_element_type=jnp.float32,
                precision=jax.lax.Precision.HIGHEST)        # (TN, TM)

    # --- d1: fold TM/128 lane groups to a (TN, 128) partial (static slices),
    #         then running elementwise min across M steps; lane-reduce + clamp once.
    part = d[:, 0:128]
    for g in range(1, tm // 128):
        part = jnp.minimum(part, d[:, g * 128:(g + 1) * 128])

    @pl.when(m == 0)
    def _():
        d1_acc[...] = part

    @pl.when(m > 0)
    def _():
        d1_acc[...] = jnp.minimum(d1_acc[...], part)

    @pl.when(m == num_m - 1)
    def _():
        d1_ref[...] = jnp.maximum(jnp.min(d1_acc[...], axis=1),
                                  0.0)[None, None, :]

    # --- d2: per-tile column mins (clamped after the reduce) accumulated into the
    #         resident full-M output block across N tiles.
    col_min = jnp.maximum(jnp.min(d, axis=0), 0.0)[None, None, :]   # (1, 1, TM)

    @pl.when(n == 0)
    def _():
        d2_ref[:, :, pl.ds(off, tm)] = col_min

    @pl.when(n > 0)
    def _():
        d2_ref[:, :, pl.ds(off, tm)] = jnp.minimum(
            d2_ref[:, :, pl.ds(off, tm)], col_min)


def _prep_lhs(p, n_padded):
    """(B, N, 3) -> (B, Np, 8) with norms folded in; padded rows masked with _BIG."""
    B, N, _ = p.shape
    p = p.astype(jnp.float32)
    sq = jnp.sum(p * p, axis=-1, keepdims=True)                     # (B, N, 1)
    ones = jnp.ones((B, N, 1), jnp.float32)
    zeros3 = jnp.zeros((B, N, 3), jnp.float32)
    feat = jnp.concatenate([p, sq, ones, zeros3], axis=-1)          # (B, N, 8)
    if n_padded > N:
        pad_row = jnp.zeros((8,), jnp.float32).at[3].set(_BIG)
        pad = jnp.broadcast_to(pad_row, (B, n_padded - N, 8))
        feat = jnp.concatenate([feat, pad], axis=1)
    return feat


def _prep_rhs_t(q, m_padded):
    """(B, M, 3) -> (B, 8, Mp), pre-transposed so no in-kernel transpose is needed."""
    B, M, _ = q.shape
    q = q.astype(jnp.float32)
    sq = jnp.sum(q * q, axis=-1, keepdims=True)                     # (B, M, 1)
    ones = jnp.ones((B, M, 1), jnp.float32)
    zeros3 = jnp.zeros((B, M, 3), jnp.float32)
    feat = jnp.concatenate([-2.0 * q, ones, sq, zeros3], axis=-1)   # (B, M, 8)
    if m_padded > M:
        pad_row = jnp.zeros((8,), jnp.float32).at[4].set(_BIG)
        pad = jnp.broadcast_to(pad_row, (B, m_padded - M, 8))
        feat = jnp.concatenate([feat, pad], axis=1)
    return jnp.transpose(feat, (0, 2, 1))                           # (B, 8, Mp)


def chamfer_distance(xyz1, xyz2):
    """Returns (dist1, dist2): squared distance from each point to its nearest
    neighbor in the other cloud. dist1: (B, N), dist2: (B, M), float32."""
    B, N, C1 = xyz1.shape
    B2, M, C2 = xyz2.shape
    assert B == B2 and C1 == 3 and C2 == 3

    TN = _pick_tile(N, _TN_MAX)
    TM = _pick_tile(M, _TM_MAX)
    Np = _round_up(N, TN)
    Mp = _round_up(M, TM)

    x = _prep_lhs(xyz1, Np)              # (B, Np, 8)
    yt = _prep_rhs_t(xyz2, Mp)           # (B, 8, Mp)

    # Keep the whole rhs feature block resident in VMEM per batch when cheap
    # (double-buffered size check); otherwise stream TM-wide tiles.
    rhs_resident = (2 * 8 * Mp * 4) <= _RESIDENT_RHS_MAX_BYTES
    if rhs_resident:
        yt_spec = pl.BlockSpec((1, 8, Mp), lambda b, n, m: (b, 0, 0))
    else:
        yt_spec = pl.BlockSpec((1, 8, TM), lambda b, n, m: (b, 0, m))

    grid = (B, Np // TN, Mp // TM)
    kernel = functools.partial(_chamfer_kernel, tm=TM, rhs_resident=rhs_resident)

    d1p, d2p = pl.pallas_call(
        kernel,
        out_shape=(
            jax.ShapeDtypeStruct((B, 1, Np), jnp.float32),
            jax.ShapeDtypeStruct((B, 1, Mp), jnp.float32),
        ),
        grid_spec=pltpu.PrefetchScalarGridSpec(
            num_scalar_prefetch=0,
            grid=grid,
            in_specs=[
                pl.BlockSpec((1, TN, 8), lambda b, n, m: (b, n, 0)),
                yt_spec,
            ],
            out_specs=[
                pl.BlockSpec((1, 1, TN), lambda b, n, m: (b, 0, n)),
                pl.BlockSpec((1, 1, Mp), lambda b, n, m: (b, 0, 0)),
            ],
            scratch_shapes=[pltpu.VMEM((TN, 128), jnp.float32)],
        ),
        compiler_params=pltpu.CompilerParams(
            # n is a reduction axis for d2 and m for d1, so they stay "arbitrary";
            # batch is the only parallel axis of this fused single pass.
            dimension_semantics=("parallel", "arbitrary", "arbitrary"),
            # 48 MiB: above the 32 MiB default (bigger tiles / resident rhs) while
            # leaving headroom under v7x's 64 MiB physical VMEM.
            vmem_limit_bytes=48 * 1024 * 1024,
        ),
    )(x, yt)

    return d1p[:, 0, :N], d2p[:, 0, :M]


class ChamferDistance:
    """JAX/Pallas equivalent of torch_point_ops.chamfer.ChamferDistance."""

    def __init__(self, reduction='mean'):
        if reduction not in ['mean', 'sum', None, 'none']:
            raise ValueError(
                f"reduction must be one of ['mean', 'sum', None, 'none'], but got {reduction}")
        self.reduction = reduction

    def __call__(self, xyz1, xyz2):
        dist1, dist2 = chamfer_distance(xyz1, xyz2)
        if self.reduction == 'mean':
            return jnp.mean(dist1) + jnp.mean(dist2)
        elif self.reduction == 'sum':
            return jnp.sum(dist1) + jnp.sum(dist2)
        else:
            return (dist1, dist2)


def _reference_chamfer(xyz1, xyz2):
    # pure-JAX reference for a sanity check
    diff = xyz1[:, :, None, :] - xyz2[:, None, :, :]       # (B, N, M, 3)
    d = jnp.sum(diff * diff, axis=-1)                       # (B, N, M)
    return jnp.min(d, axis=2), jnp.min(d, axis=1)


if __name__ == "__main__":
    key = jax.random.PRNGKey(0)
    k1, k2 = jax.random.split(key)
    B, N, M = 2, 128, 64
    xyz1 = jax.random.normal(k1, (B, N, 3), dtype=jnp.float32)
    xyz2 = jax.random.normal(k2, (B, M, 3), dtype=jnp.float32)

    module = ChamferDistance(reduction='mean')
    out = jax.block_until_ready(module(xyz1, xyz2))

    # correctness check against pure-JAX reference
    r1, r2 = _reference_chamfer(xyz1, xyz2)
    ref = jnp.mean(r1) + jnp.mean(r2)
    assert jnp.allclose(out, ref, atol=1e-4, rtol=1e-4), (out, ref)

    # 'none' path (per-point distances straight from the kernel)
    d1, d2 = ChamferDistance(reduction=None)(xyz1, xyz2)
    jax.block_until_ready((d1, d2))
    assert d1.shape == (B, N) and d2.shape == (B, M)
    assert jnp.allclose(d1, r1, atol=1e-4, rtol=1e-4)
    assert jnp.allclose(d2, r2, atol=1e-4, rtol=1e-4)

    # exercise padding + multi-tile accumulation on both axes (non-divisible shapes)
    k3, k4 = jax.random.split(k2)
    xa = jax.random.normal(k3, (1, 300, 3), dtype=jnp.float32)
    xb = jax.random.normal(k4, (1, 520, 3), dtype=jnp.float32)
    da, db = chamfer_distance(xa, xb)
    jax.block_until_ready((da, db))
    ra, rb = _reference_chamfer(xa, xb)
    assert jnp.allclose(da, ra, atol=1e-4, rtol=1e-4)
    assert jnp.allclose(db, rb, atol=1e-4, rtol=1e-4)

    # clustered (near-duplicate) points: stresses the folded-norm cancellation path
    base = jax.random.normal(k1, (1, 1, 3), dtype=jnp.float32) * 3.0
    xc = base + 1e-3 * jax.random.normal(k3, (1, 256, 3), dtype=jnp.float32)
    xd = base + 1e-3 * jax.random.normal(k4, (1, 192, 3), dtype=jnp.float32)
    dc, dd = chamfer_distance(xc, xd)
    jax.block_until_ready((dc, dd))
    rc, rd = _reference_chamfer(xc, xd)
    assert jnp.allclose(dc, rc, atol=1e-5), (jnp.max(jnp.abs(dc - rc)))
    assert jnp.allclose(dd, rd, atol=1e-5), (jnp.max(jnp.abs(dd - rd)))

    print("KERNEL_OK")
</pallas_src>

<mosaic_0001>
module attributes {stable_mosaic.version = 11 : i64} {
  func.func @_chamfer_kernel(%arg0: i32, %arg1: i32, %arg2: i32, %arg3: memref<1x128x8xf32, #tpu.memory_space<vmem>>, %arg4: memref<1x8x128xf32, #tpu.memory_space<vmem>>, %arg5: memref<1x1x128xf32, #tpu.memory_space<vmem>>, %arg6: memref<1x1x128xf32, #tpu.memory_space<vmem>>, %arg7: memref<128x128xf32, #tpu.memory_space<vmem>>) attributes {dimension_semantics = [#tpu.dimension_semantics<parallel>, #tpu.dimension_semantics<arbitrary>, #tpu.dimension_semantics<arbitrary>], iteration_bounds = array<i64: 2, 1, 1>, scalar_prefetch = 0 : i64, scratch_operands = 1 : i64, tpu.core_type = #tpu.core_type<tc>, window_params = [{transform_indices = @transform_0, window_bounds = array<i64: 1, 128, 8>}, {transform_indices = @transform_1, window_bounds = array<i64: 1, 8, 128>}, {transform_indices = @transform_2, window_bounds = array<i64: 1, 1, 128>}, {transform_indices = @transform_3, window_bounds = array<i64: 1, 1, 128>}]} {
    %c128_i32 = arith.constant 128 : i32
    %0 = arith.muli %arg2, %c128_i32 : i32
    %1 = tpu.assume_multiple %0, 128 : i32
    %c0 = arith.constant 0 : index
    %c0_0 = arith.constant 0 : index
    %c0_1 = arith.constant 0 : index
    %2 = vector.load %arg3[%c0, %c0_0, %c0_1] : memref<1x128x8xf32, #tpu.memory_space<vmem>>, vector<1x128x8xf32>
    %3 = vector.shape_cast %2 : vector<1x128x8xf32> to vector<128x8xf32>
    %c0_2 = arith.constant 0 : index
    %c0_3 = arith.constant 0 : index
    %4 = arith.index_cast %1 : i32 to index
    %5 = vector.load %arg4[%c0_2, %c0_3, %4] : memref<1x8x128xf32, #tpu.memory_space<vmem>>, vector<1x8x128xf32>
    %6 = vector.shape_cast %5 : vector<1x8x128xf32> to vector<8x128xf32>
    %cst = arith.constant dense<0.000000e+00> : vector<128x128xf32>
    %7 = tpu.matmul %3, %6, %cst {dimension_numbers = #tpu.dot_dimension_numbers<[1], [0], [0], [1], [0, 0, 1, 1], [], []>, precision = #tpu.contract_precision<fp32>} : vector<128x8xf32>, vector<8x128xf32>, vector<128x128xf32> -> vector<128x128xf32>
    %c0_i32 = arith.constant 0 : i32
    %8 = arith.cmpi eq, %arg2, %c0_i32 : i32
    %9 = arith.extui %8 : i1 to i32
    %c0_i32_4 = arith.constant 0 : i32
    %10 = arith.cmpi ne, %9, %c0_i32_4 : i32
    scf.if %10 {
      %c0_15 = arith.constant 0 : index
      %c0_16 = arith.constant 0 : index
      %27 = vector.load %arg7[%c0_15, %c0_16] : memref<128x128xf32, #tpu.memory_space<vmem>>, vector<128x128xf32>
      tpu.vector_store %arg7[%c0_15, %c0_16], %7 {strides = array<i32>} : memref<128x128xf32, #tpu.memory_space<vmem>>, vector<128x128xf32>,
    } else {
    }
    %c0_i32_5 = arith.constant 0 : i32
    %11 = arith.cmpi sgt, %arg2, %c0_i32_5 : i32
    %12 = arith.extui %11 : i1 to i32
    %c0_i32_6 = arith.constant 0 : i32
    %13 = arith.cmpi ne, %12, %c0_i32_6 : i32
    scf.if %13 {
      %c0_15 = arith.constant 0 : index
      %c0_16 = arith.constant 0 : index
      %27 = vector.load %arg7[%c0_15, %c0_16] : memref<128x128xf32, #tpu.memory_space<vmem>>, vector<128x128xf32>
      %28 = arith.minimumf %27, %7 : vector<128x128xf32>
      %c0_17 = arith.constant 0 : index
      %c0_18 = arith.constant 0 : index
      %29 = vector.load %arg7[%c0_17, %c0_18] : memref<128x128xf32, #tpu.memory_space<vmem>>, vector<128x128xf32>
      tpu.vector_store %arg7[%c0_17, %c0_18], %28 {strides = array<i32>} : memref<128x128xf32, #tpu.memory_space<vmem>>, vector<128x128xf32>,
    } else {
    }
    %c0_i32_7 = arith.constant 0 : i32
    %14 = arith.cmpi eq, %arg2, %c0_i32_7 : i32
    %15 = arith.extui %14 : i1 to i32
    %c0_i32_8 = arith.constant 0 : i32
    %16 = arith.cmpi ne, %15, %c0_i32_8 : i32
    scf.if %16 {
      %c0_15 = arith.constant 0 : index
      %c0_16 = arith.constant 0 : index
      %27 = vector.load %arg7[%c0_15, %c0_16] : memref<128x128xf32, #tpu.memory_space<vmem>>, vector<128x128xf32>
      %cst_17 = arith.constant dense<0x7F800000> : vector<128xf32>
      %28 = vector.multi_reduction <minimumf>, %27, %cst_17 [1] : vector<128x128xf32> to vector<128xf32>
      %cst_18 = arith.constant 0.000000e+00 : f32
      %29 = vector.broadcast %cst_18 : f32 to vector<128xf32>
      %30 = arith.maximumf %28, %29 : vector<128xf32>
      %31 = vector.shape_cast %30 : vector<128xf32> to vector<1x1x128xf32>
      %c0_19 = arith.constant 0 : index
      %c0_20 = arith.constant 0 : index
      %c0_21 = arith.constant 0 : index
      %32 = vector.load %arg5[%c0_19, %c0_20, %c0_21] : memref<1x1x128xf32, #tpu.memory_space<vmem>>, vector<1x1x128xf32>
      tpu.vector_store %arg5[%c0_19, %c0_20, %c0_21], %31 {strides = array<i32>} : memref<1x1x128xf32, #tpu.memory_space<vmem>>, vector<1x1x128xf32>,
    } else {
    }
    %cst_9 = arith.constant dense<0x7F800000> : vector<128xf32>
    %17 = vector.multi_reduction <minimumf>, %7, %cst_9 [0] : vector<128x128xf32> to vector<128xf32>
    %cst_10 = arith.constant 0.000000e+00 : f32
    %18 = vector.broadcast %cst_10 : f32 to vector<128xf32>
    %19 = arith.maximumf %17, %18 : vector<128xf32>
    %20 = vector.shape_cast %19 : vector<128xf32> to vector<1x1x128xf32>
    %c0_i32_11 = arith.constant 0 : i32
    %21 = arith.cmpi eq, %arg1, %c0_i32_11 : i32
    %22 = arith.extui %21 : i1 to i32
    %c0_i32_12 = arith.constant 0 : i32
    %23 = arith.cmpi ne, %22, %c0_i32_12 : i32
    scf.if %23 {
      %c0_15 = arith.constant 0 : index
      %c0_16 = arith.constant 0 : index
      %27 = arith.index_cast %1 : i32 to index
      %28 = vector.load %arg6[%c0_15, %c0_16, %27] : memref<1x1x128xf32, #tpu.memory_space<vmem>>, vector<1x1x128xf32>
      tpu.vector_store %arg6[%c0_15, %c0_16, %27], %20 {strides = array<i32>} : memref<1x1x128xf32, #tpu.memory_space<vmem>>, vector<1x1x128xf32>,
    } else {
    }
    %c0_i32_13 = arith.constant 0 : i32
    %24 = arith.cmpi sgt, %arg1, %c0_i32_13 : i32
    %25 = arith.extui %24 : i1 to i32
    %c0_i32_14 = arith.constant 0 : i32
    %26 = arith.cmpi ne, %25, %c0_i32_14 : i32
    scf.if %26 {
      %c0_15 = arith.constant 0 : index
      %c0_16 = arith.constant 0 : index
      %27 = arith.index_cast %1 : i32 to index
      %28 = vector.load %arg6[%c0_15, %c0_16, %27] : memref<1x1x128xf32, #tpu.memory_space<vmem>>, vector<1x1x128xf32>
      %29 = arith.minimumf %28, %20 : vector<1x1x128xf32>
      %c0_17 = arith.constant 0 : index
      %c0_18 = arith.constant 0 : index
      %30 = arith.index_cast %1 : i32 to index
      %31 = vector.load %arg6[%c0_17, %c0_18, %30] : memref<1x1x128xf32, #tpu.memory_space<vmem>>, vector<1x1x128xf32>
      tpu.vector_store %arg6[%c0_17, %c0_18, %30], %29 {strides = array<i32>} : memref<1x1x128xf32, #tpu.memory_space<vmem>>, vector<1x1x128xf32>,
    } else {
    }
    return
  }
  func.func @transform_0(%arg0: i32, %arg1: i32, %arg2: i32) -> (i32, i32, i32) {
    %c0_i32 = arith.constant 0 : i32
    %c0_i32_0 = arith.constant 0 : i32
    return %arg0, %arg1, %c0_i32 : i32, i32, i32
  }
  func.func @transform_1(%arg0: i32, %arg1: i32, %arg2: i32) -> (i32, i32, i32) {
    %c0_i32 = arith.constant 0 : i32
    %c0_i32_0 = arith.constant 0 : i32
    %c0_i32_1 = arith.constant 0 : i32
    return %arg0, %c0_i32, %c0_i32_0 : i32, i32, i32
  }
  func.func @transform_2(%arg0: i32, %arg1: i32, %arg2: i32) -> (i32, i32, i32) {
    %c0_i32 = arith.constant 0 : i32
    %c0_i32_0 = arith.constant 0 : i32
    return %arg0, %c0_i32, %arg1 : i32, i32, i32
  }
  func.func @transform_3(%arg0: i32, %arg1: i32, %arg2: i32) -> (i32, i32, i32) {
    %c0_i32 = arith.constant 0 : i32
    %c0_i32_0 = arith.constant 0 : i32
    %c0_i32_1 = arith.constant 0 : i32
    return %arg0, %c0_i32, %c0_i32_0 : i32, i32, i32
  }
}

</mosaic_0001>

<bundles_post_ra>
// kernel: tpu_custom_call.1
= control target key start
LH: loop header
LB: loop body
LE: loop exit
PB: predicated region body
PF: predicated region fallthrough
CT: control target
= control target key end

     0   :  { %9 = vsyncpa [#allocation4], 0  ;;  %s2798_s0 = inlined_call_operand.vmem [shape: f32[2,128,8], index: 0, kind: input, shape index: {}]   ;;  %s2799_s1 = inlined_call_operand.vmem [shape: f32[2,8,128], index: 1, kind: input, shape index: {}]   ;;  %s2800_s2 = inlined_call_operand.hbm [shape: f32[2,1,128], index: 2, kind: output, shape index: {0}]   ;;  %s2801_s3 = inlined_call_operand.hbm [shape: f32[2,1,128], index: 3, kind: output, shape index: {1}]  }
   0x1   :  { %11 = vsyncpa [#allocation4 + $0x1], 0 }
   0x2   :  { %12 = vsyncpa [#allocation6], 0 }
   0x3   :  { %14 = vsyncpa [#allocation6 + $0x1], 0  ;;  %s2389_s12 = smov 0   ;;  %s2391_s13 = smov 0  }
   0x4   :  { %s2393_s14 = smov 0   ;;  %s2395_s15 = smov 0  }
   0x5   :  { %s2397_s16 = smov 0   ;;  %s2399_s17 = smov 0  }
   0x6 LB: > { %s1844_s18 = sadd.s32 4294967295, %s2365_s17   ;;  %s1845_s19 = sadd.s32 4294967294, %s2365_s17   ;;  %s2365_s17 = sphi %s2399_s17, %s20_s17   ;;  %s2361_s16 = sphi %s2397_s16, %s2808_s16   ;;  %s2357_s15 = sphi %s2395_s15, %s2807_s15   ;;  %s2353_s14 = sphi %s2393_s14, %s2806_s14   ;;  %s2349_s13 = sphi %s2391_s13, %s2805_s13   ;;  %s2345_s12 = sphi %s2389_s12, %s2804_s12  }
   0x7   : > { %s39_s20 = sadd.s32 1, %s2361_s16  ;;  %s102_s21 = sadd.s32 1, %s2353_s14 }
   0x8   : > { %p41_p0 = scmp.ge.s32.totalorder %s39_s20, 2  ;;  %p112_p1 = scmp.ne.s32.totalorder %s2353_s14, %s2349_s13 }
   0x9   : > { %p113_p2 = scmp.eq.s32.totalorder %s1844_s18, 1  ;;  %p118_p3 = scmp.ne.s32.totalorder %s2349_s13, %s2345_s12 }
   0xa   : > { %s2810_s20 = smov (%p41_p0, %s39_s20), 0  ;;  %p119_p5 = scmp.eq.s32.totalorder %s1845_s19, 1 }
   0xb   : > { %p2429_p4 = por %p113_p2, %p112_p1  ;;  %s97_s23 = ssub.s32 %s2361_s16, %s2810_s20 }
   0xc   : > { %p1848_p6 = scmp.ge.s32.totalorder %s2365_s17, 1  ;;  %p100_p7 = scmp.eq.s32.totalorder %s97_s23, 0 }
   0xd   : > { %p2436_p8 = por %p119_p5, %p118_p3  ;;  %p183_p9 = scmp.lt.s32.totalorder %s2365_s17, 3 }
   0xe   : > { %s2442_s25 = scalar_select %p100_p7, %s2353_s14, %s102_s21  }
   0xf   : > { %p184_p10 = pnand %p1848_p6, %p183_p9 }
  0x10   : > { %p219_p11 = scmp.lt.s32.totalorder (!%p184_p10), %s2357_s15, 1  ;;  %vm253_vm0 = vcmask (!%p184_p10), 64512   ;;  %s2678_s8 = sand.u32 (!%p184_p10), 1, %s2349_s13  }
  0x11   : > { %187 = sbr.rel (%p184_p10) target bundleno = 513 (0x201), region = 28  ;;  %s217_s9 = scalar_lea.vmem (!%p184_p10), [#allocation5], %s2678_s8 }
  0x12   : > { %s1852_s10 = sshll.u32 (!%p184_p10), %s2357_s15, 4  ;;  %s1728_s21 = sshll.u32 (!%p184_p10), %s217_s9, 4  ;;  %s1729_s21 = int_to_ptr.vmem [resolvable:$true] %s1728_s21 }
  0x13   : > { %s2687_s19 = scalar_lea.hbm (!%p184_p10), %s2801_s3, %s1852_s10  ;;  %s1702_s23 = scalar_lea.sflag (!%p184_p10), [#allocation6], %s2678_s8 }
  0x18   : > { %s220_s26 = scalar_select %p219_p11, %s2357_s15, 1 }
  0x1a   : > { %s1856_s27 = sshll.u32 %s220_s26, 7  ;;  %s1851_s28 = sshll.u32 %s220_s26, 3 }
  0x1b   : > { %s2449_s4 = scalar_lea.vmem %s2798_s0, %s1856_s27  ;;  %s231_s7 = scalar_lea.vmem %s2799_s1, %s1851_s28 }
  0x1c   : > { %v252_v0 = vld [vmem:[%s231_s7] sm:$0xff]  ;;  %v234_v2 = vld [vmem:[%s2449_s4 + $0x8] sm:$0xff]  ;;  %v235_v6 = vld [vmem:[%s2449_s4 + $0x10] sm:$0xff]  ;;  %s2255_s26 = scalar_lea.vmem %s1729_s21, 16  ;;  %s2367_s27 = smov [#allocation5]  }
  0x1d   : > { %v233_v1 = vld [vmem:[%s2449_s4] sm:$0xff]  ;;  %v2456_v3 = vand.u32 4294901760, %v252_v0  ;;  %v258_v5 = vsel %vm253_vm0, %v234_v2, 0  ;;  %v236_v7 = vld [vmem:[%s2449_s4 + $0x18] sm:$0xff]  ;;  %v261_v11 = vsel %vm253_vm0, %v235_v6, 0  ;;  %v238_v13 = vld [vmem:[%s2449_s4 + $0x28] sm:$0xff]  ;;  %p2256_p12 = scmp.ne.s32.totalorder %s1729_s21, %s2255_s26 }
  0x1e   : > { %v255_v4 = vsel %vm253_vm0, %v233_v1, 0  ;;  %v237_v8 = vld [vmem:[%s2449_s4 + $0x20] sm:$0xff]  ;;  %v2465_v10 = vand.u32 4294901760, %v258_v5  ;;  %v264_v12 = vsel %vm253_vm0, %v236_v7, 0  ;;  %v2475_v15 = vand.u32 4294901760, %v261_v11  ;;  %v239_v18 = vld [vmem:[%s2449_s4 + $0x30] sm:$0xff] }
  0x1f   : > { %v2463_v9 = vand.u32 4294901760, %v255_v4  ;;  %2037 = vmatprep.subr.mxu0 %v2456_v3  ;;  %1959 = vmatprep.subr.mxu1 %v2456_v3  ;;  %v2473_v14 = vsub.f32 %v252_v0, %v2456_v3  ;;  %v2477_v16 = vand.u32 4294901760, %v264_v12  ;;  %v267_v17 = vsel %vm253_vm0, %v237_v8, 0  ;;  %v240_v39 = vld [vmem:[%s2449_s4 + $0x38] sm:$0xff]  ;;  %v241_v44 = vld [vmem:[%s2449_s4 + $0x40] sm:$0xff]  ;;  %v242_v49 = vld [vmem:[%s2449_s4 + $0x48] sm:$0xff]  ;;  %p2257_p13 = pnand %p2256_p12, %p2429_p4 }
  0x20   : > { %2038 = vmatpush3.msra.mxu0 %v2456_v3  ;;  %v2486_v20 = vsub.f32 %v258_v5, %v2465_v10  ;;  %1960 = vmatpush3.msra.mxu1 %v2456_v3  ;;  %v2489_v21 = vand.u32 4294901760, %v267_v17  ;;  %v270_v22 = vsel %vm253_vm0, %v238_v13, 0  ;;  %v2494_v24 = vsub.f32 %v261_v11, %v2475_v15  ;;  %v243_v50 = vld [vmem:[%s2449_s4 + $0x50] sm:$0xff]  ;;  %v244_v55 = vld [vmem:[%s2449_s4 + $0x58] sm:$0xff]  ;;  %v245_v60 = vld [vmem:[%s2449_s4 + $0x60] sm:$0xff]  ;;  %s2259_s28 = sshll.u32 %s2367_s27, 4  ;;  %s2260_s28 = int_to_ptr.vmem [resolvable:$false] %s2259_s28 }
  0x21   : > { %v2483_v19 = vsub.f32 %v255_v4, %v2463_v9  ;;  %v531_v23 = vand.u32 4294901760, %v2473_v14  ;;  %v2497_v25 = vsub.f32 %v264_v12, %v2477_v16  ;;  %v2499_v26 = vand.u32 4294901760, %v270_v22  ;;  %v246_v61 = vld [vmem:[%s2449_s4 + $0x68] sm:$0xff]  ;;  %v247_v13 = vld [vmem:[%s2449_s4 + $0x70] sm:$0xff]  ;;  %p2258_p0 = pneg %p2257_p13  ;;  %s2261_s29 = scalar_lea.vmem %s2260_s28, 32 }
  0x22   : > { %v380_v28 = vand.u32 4294901760, %v2486_v20  ;;  %v2504_v29 = vsub.f32 %v267_v17, %v2489_v21  ;;  %v273_v30 = vsel %vm253_vm0, %v239_v18, 0  ;;  %v390_v32 = vand.u32 4294901760, %v2494_v24  ;;  %p2262_p1 = scmp.lt.s32.totalorder %s1729_s21, %s2260_s28  ;;  %p2263_p2 = scmp.lt.s32.totalorder %s2261_s29, %s2255_s26 }
  0x23   : > { %v370_v27 = vand.u32 4294901760, %v2483_v19  ;;  %v532_v31 = vsub.f32 %v2473_v14, %v531_v23  ;;  %2063 = vmatprep.subr.mxu0 %v531_v23  ;;  %v400_v33 = vand.u32 4294901760, %v2497_v25  ;;  %v2511_v34 = vsub.f32 %v270_v22, %v2499_v26 }
  0x24   : > { %v381_v36 = vsub.f32 %v2486_v20, %v380_v28  ;;  %v410_v37 = vand.u32 4294901760, %v2504_v29  ;;  %v2516_v38 = vand.u32 4294901760, %v273_v30  ;;  %v391_v41 = vsub.f32 %v2494_v24, %v390_v32  ;;  %p2264_p3 = por %p2263_p2, %p2262_p1 }
  0x25   : > { %2039 = vmatprep.mubr.f32.mxu0 %v370_v27  ;;  %v371_v35 = vsub.f32 %v2483_v19, %v370_v27  ;;  %v533_v40 = vand.u32 4294901760, %v532_v31  ;;  %v401_v42 = vsub.f32 %v2497_v25, %v400_v33  ;;  %v420_v43 = vand.u32 4294901760, %v2511_v34 }
  0x26   : > { %2040 = vmatmul.mubr.f32.vlgmr.msra.gmra.mrb[0].mxu0 %v380_v28  ;;  %v382_v46 = vand.u32 4294901760, %v381_v36  ;;  %v411_v47 = vsub.f32 %v2504_v29, %v410_v37  ;;  %v2525_v48 = vsub.f32 %v273_v30, %v2516_v38  ;;  %v392_v51 = vand.u32 4294901760, %v391_v41  ;;  %v248_v41 = vld [vmem:[%s2449_s4 + $0x78] sm:$0xff]  ;;  %p2265_p5 = pnand %p2264_p3, %p2258_p0 }
  0x27   : > { %v372_v45 = vand.u32 4294901760, %v371_v35  ;;  %2042 = vmatprep.mubr.f32.mxu0 %v390_v32  ;;  %2064 = vmatpush3.msra.mxu0 %v531_v23  ;;  %v402_v52 = vand.u32 4294901760, %v401_v42  ;;  %v421_v53 = vsub.f32 %v2511_v34, %v420_v43  ;;  %v276_v54 = vsel %vm253_vm0, %v240_v39, 0 }
  0x28   : > { %1985 = vmatprep.subr.mxu1 %v533_v40  ;;  %2089 = vmatprep.subr.mxu0 %v2456_v3  ;;  %v412_v56 = vand.u32 4294901760, %v411_v47  ;;  %v430_v57 = vand.u32 4294901760, %v2525_v48  ;;  %v2534_v58 = vand.u32 4294901760, %v276_v54  ;;  %v279_v59 = vsel %vm253_vm0, %v241_v44, 0 }
  0x29   : > { %1961 = vmatprep.mubr.f32.mxu1 %v372_v45  ;;  %v422_v62 = vand.u32 4294901760, %v421_v53  ;;  %v2539_v63 = vand.u32 4294901760, %v279_v59  ;;  %v282_v0 = vsel %vm253_vm0, %v242_v49, 0  ;;  %v285_v1 = vsel %vm253_vm0, %v243_v50, 0 }
  0x2a   : > { %1962 = vmatmul.mubr.f32.vlgmr.msra.gmra.mrb[0].mxu1 %v382_v46  ;;  %2043 = vmatmul.mubr.f32.gmra.mrb[2].mxu0 %v400_v33  ;;  %v2544_v2 = vsub.f32 %v276_v54, %v2534_v58  ;;  %v431_v4 = vsub.f32 %v2525_v48, %v430_v57  ;;  %v2547_v5 = vand.u32 4294901760, %v282_v0  ;;  %v2549_v6 = vand.u32 4294901760, %v285_v1 }
  0x2b   : > { %1986 = vmatpush3.msra.mxu1 %v533_v40  ;;  %1964 = vmatprep.mubr.f32.mxu1 %v392_v51  ;;  %v2552_v7 = vsub.f32 %v279_v59, %v2539_v63  ;;  %v288_v8 = vsel %vm253_vm0, %v244_v55, 0  ;;  %v291_v11 = vsel %vm253_vm0, %v245_v60, 0  ;;  %v294_v12 = vsel %vm253_vm0, %v246_v61, 0 }
  0x2c   : > { %2045 = vmatprep.mubr.f32.mxu0 %v410_v37  ;;  %2011 = vmatprep.subr.mxu1 %v2473_v14  ;;  %v440_v17 = vand.u32 4294901760, %v2544_v2  ;;  %v432_v18 = vand.u32 4294901760, %v431_v4  ;;  %v2561_v22 = vsub.f32 %v282_v0, %v2547_v5  ;;  %v2564_v23 = vsub.f32 %v285_v1, %v2549_v6 }
  0x2d   : > { %v450_v27 = vand.u32 4294901760, %v2552_v7  ;;  %v2567_v28 = vand.u32 4294901760, %v288_v8  ;;  %v2569_v30 = vand.u32 4294901760, %v291_v11  ;;  %v2571_v31 = vand.u32 4294901760, %v294_v12 }
  0x2e   : > { %1965 = vmatmul.mubr.f32.gmra.mrb[2].mxu1 %v402_v52  ;;  %2046 = vmatmul.mubr.f32.gmra.mrb[4].mxu0 %v420_v43  ;;  %v441_v32 = vsub.f32 %v2544_v2, %v440_v17  ;;  %v460_v33 = vand.u32 4294901760, %v2561_v22  ;;  %v470_v35 = vand.u32 4294901760, %v2564_v23  ;;  %v297_v36 = vsel %vm253_vm0, %v247_v13, 0 }
  0x2f   : > { %1967 = vmatprep.mubr.f32.mxu1 %v412_v56  ;;  %2048 = vmatprep.mubr.f32.mxu0 %v430_v57  ;;  %v451_v37 = vsub.f32 %v2552_v7, %v450_v27  ;;  %v2579_v39 = vsub.f32 %v288_v8, %v2567_v28  ;;  %v2582_v40 = vsub.f32 %v291_v11, %v2569_v30  ;;  %v2588_v43 = vand.u32 4294901760, %v297_v36 }
  0x30   : > { %v2586_v42 = vsub.f32 %v294_v12, %v2571_v31  ;;  %v442_v44 = vand.u32 4294901760, %v441_v32  ;;  %v461_v45 = vsub.f32 %v2561_v22, %v460_v33  ;;  %v471_v47 = vsub.f32 %v2564_v23, %v470_v35 }
  0x31   : > { %v480_v46 = vand.u32 4294901760, %v2579_v39  ;;  %v452_v49 = vand.u32 4294901760, %v451_v37  ;;  %v490_v50 = vand.u32 4294901760, %v2582_v40  ;;  %v2595_v51 = vsub.f32 %v297_v36, %v2588_v43 }
  0x32   : > { %1968 = vmatmul.mubr.f32.gmra.mrb[4].mxu1 %v422_v62  ;;  %2049 = vmatmul.mubr.f32.gmra.mrb[6].mxu0 %v440_v17  ;;  %v300_v52 = vsel %vm253_vm0, %v248_v41, 0  ;;  %v462_v54 = vand.u32 4294901760, %v461_v45  ;;  %v500_v56 = vand.u32 4294901760, %v2586_v42  ;;  %v472_v59 = vand.u32 4294901760, %v471_v47 }
  0x33   : > { %1970 = vmatprep.mubr.f32.mxu1 %v432_v18  ;;  %2051 = vmatprep.mubr.f32.mxu0 %v450_v27  ;;  %v2598_v53 = vand.u32 4294901760, %v300_v52  ;;  %v481_v55 = vsub.f32 %v2579_v39, %v480_v46  ;;  %v491_v60 = vsub.f32 %v2582_v40, %v490_v50  ;;  %v510_v61 = vand.u32 4294901760, %v2595_v51 }
  0x34   : > { %v501_v0 = vsub.f32 %v2586_v42, %v500_v56 }
  0x35   : > { %v2603_v57 = vsub.f32 %v300_v52, %v2598_v53  ;;  %v482_v62 = vand.u32 4294901760, %v481_v55  ;;  %v492_v4 = vand.u32 4294901760, %v491_v60  ;;  %v511_v8 = vsub.f32 %v2595_v51, %v510_v61 }
  0x36   : > { %1971 = vmatmul.mubr.f32.gmra.mrb[6].mxu1 %v442_v44  ;;  %2052 = vmatmul.mubr.f32.gmra.mrb[8].mxu0 %v460_v33  ;;  %v502_v11 = vand.u32 4294901760, %v501_v0 }
  0x37   : > { %1973 = vmatprep.mubr.f32.mxu1 %v452_v49  ;;  %2054 = vmatprep.mubr.f32.mxu0 %v470_v35  ;;  %v520_v1 = vand.u32 4294901760, %v2603_v57  ;;  %v512_v13 = vand.u32 4294901760, %v511_v8 }
  0x39   : > { %v521_v12 = vsub.f32 %v2603_v57, %v520_v1 }
  0x3a   : > { %1974 = vmatmul.mubr.f32.gmra.mrb[8].mxu1 %v462_v54  ;;  %2055 = vmatmul.mubr.f32.gmra.mrb[10].mxu0 %v480_v46 }
  0x3b   : > { %1976 = vmatprep.mubr.f32.mxu1 %v472_v59  ;;  %2057 = vmatprep.mubr.f32.mxu0 %v490_v50  ;;  %v522_v17 = vand.u32 4294901760, %v521_v12 }
  0x3e   : > { %1977 = vmatmul.mubr.f32.gmra.mrb[10].mxu1 %v482_v62  ;;  %2058 = vmatmul.mubr.f32.gmra.mrb[12].mxu0 %v500_v56 }
  0x3f   : > { %1979 = vmatprep.mubr.f32.mxu1 %v492_v4  ;;  %2060 = vmatprep.mubr.f32.mxu0 %v510_v61 }
  0x42   : > { %1980 = vmatmul.mubr.f32.gmra.mrb[12].mxu1 %v502_v11  ;;  %2061 = vmatmul.mubr.f32.gmra.mrb[14].mxu0 %v520_v1 }
  0x43   : > { %1982 = vmatprep.mubr.f32.mxu1 %v512_v13  ;;  %2065 = vmatprep.mubr.f32.mxu0 %v2463_v9 }
  0x46   : > { %1983 = vmatmul.mubr.f32.gmra.mrb[14].mxu1 %v522_v17  ;;  %2066 = vmatmul.mubr.f32.vlgmr.msra.gmra.mrb[0].mxu0 %v2465_v10 }
  0x47   : > { %1987 = vmatprep.mubr.f32.mxu1 %v2463_v9  ;;  %2068 = vmatprep.mubr.f32.mxu0 %v2475_v15 }
  0x48   : > { %2090 = vmatpush3.msra.mxu0 %v2456_v3 }
  0x4a   : > { %1988 = vmatmul.mubr.f32.vlgmr.msra.gmra.mrb[0].mxu1 %v2465_v10  ;;  %2069 = vmatmul.mubr.f32.gmra.mrb[2].mxu0 %v2477_v16 }
  0x4b   : > { %2012 = vmatpush3.msra.mxu1 %v2473_v14  ;;  %1990 = vmatprep.mubr.f32.mxu1 %v2475_v15 }
  0x4c   : > { %2071 = vmatprep.mubr.f32.mxu0 %v2489_v21 }
  0x4e   : > { %1991 = vmatmul.mubr.f32.gmra.mrb[2].mxu1 %v2477_v16  ;;  %2072 = vmatmul.mubr.f32.gmra.mrb[4].mxu0 %v2499_v26 }
  0x4f   : > { %1993 = vmatprep.mubr.f32.mxu1 %v2489_v21  ;;  %2074 = vmatprep.mubr.f32.mxu0 %v2516_v38 }
  0x52   : > { %1994 = vmatmul.mubr.f32.gmra.mrb[4].mxu1 %v2499_v26  ;;  %2075 = vmatmul.mubr.f32.gmra.mrb[6].mxu0 %v2534_v58 }
  0x53   : > { %1996 = vmatprep.mubr.f32.mxu1 %v2516_v38  ;;  %2077 = vmatprep.mubr.f32.mxu0 %v2539_v63 }
  0x56   : > { %1997 = vmatmul.mubr.f32.gmra.mrb[6].mxu1 %v2534_v58  ;;  %2078 = vmatmul.mubr.f32.gmra.mrb[8].mxu0 %v2547_v5 }
  0x57   : > { %1999 = vmatprep.mubr.f32.mxu1 %v2539_v63  ;;  %2080 = vmatprep.mubr.f32.mxu0 %v2549_v6 }
  0x5a   : > { %2000 = vmatmul.mubr.f32.gmra.mrb[8].mxu1 %v2547_v5  ;;  %2081 = vmatmul.mubr.f32.gmra.mrb[10].mxu0 %v2567_v28 }
  0x5b   : > { %2002 = vmatprep.mubr.f32.mxu1 %v2549_v6  ;;  %2083 = vmatprep.mubr.f32.mxu0 %v2569_v30 }
  0x5e   : > { %2003 = vmatmul.mubr.f32.gmra.mrb[10].mxu1 %v2567_v28  ;;  %2084 = vmatmul.mubr.f32.gmra.mrb[12].mxu0 %v2571_v31 }
  0x5f   : > { %2005 = vmatprep.mubr.f32.mxu1 %v2569_v30  ;;  %2086 = vmatprep.mubr.f32.mxu0 %v2588_v43 }
  0x62   : > { %2006 = vmatmul.mubr.f32.gmra.mrb[12].mxu1 %v2571_v31  ;;  %2087 = vmatmul.mubr.f32.gmra.mrb[14].mxu0 %v2598_v53 }
  0x63   : > { %2008 = vmatprep.mubr.f32.mxu1 %v2588_v43  ;;  %2091 = vmatprep.mubr.f32.mxu0 %v2463_v9 }
  0x66   : > { %2009 = vmatmul.mubr.f32.gmra.mrb[14].mxu1 %v2598_v53  ;;  %2092 = vmatmul.mubr.f32.vlgmr.msra.gmra.mrb[0].mxu0 %v2465_v10 }
  0x67   : > { %2013 = vmatprep.mubr.f32.mxu1 %v2483_v19  ;;  %2094 = vmatprep.mubr.f32.mxu0 %v2475_v15 }
  0x6a   : > { %2014 = vmatmul.mubr.f32.vlgmr.msra.gmra.mrb[0].mxu1 %v2486_v20  ;;  %2095 = vmatmul.mubr.f32.gmra.mrb[2].mxu0 %v2477_v16 }
  0x6b   : > { %2016 = vmatprep.mubr.f32.mxu1 %v2494_v24  ;;  %2097 = vmatprep.mubr.f32.mxu0 %v2489_v21 }
  0x6e   : > { %2017 = vmatmul.mubr.f32.gmra.mrb[2].mxu1 %v2497_v25  ;;  %2098 = vmatmul.mubr.f32.gmra.mrb[4].mxu0 %v2499_v26 }
  0x6f   : > { %2019 = vmatprep.mubr.f32.mxu1 %v2504_v29  ;;  %2100 = vmatprep.mubr.f32.mxu0 %v2516_v38 }
  0x72   : > { %2020 = vmatmul.mubr.f32.gmra.mrb[4].mxu1 %v2511_v34  ;;  %2101 = vmatmul.mubr.f32.gmra.mrb[6].mxu0 %v2534_v58 }
  0x73   : > { %2022 = vmatprep.mubr.f32.mxu1 %v2525_v48  ;;  %2103 = vmatprep.mubr.f32.mxu0 %v2539_v63 }
  0x76   : > { %2023 = vmatmul.mubr.f32.gmra.mrb[6].mxu1 %v2544_v2  ;;  %2104 = vmatmul.mubr.f32.gmra.mrb[8].mxu0 %v2547_v5 }
  0x77   : > { %2025 = vmatprep.mubr.f32.mxu1 %v2552_v7  ;;  %2106 = vmatprep.mubr.f32.mxu0 %v2549_v6 }
  0x7a   : > { %2026 = vmatmul.mubr.f32.gmra.mrb[8].mxu1 %v2561_v22  ;;  %2107 = vmatmul.mubr.f32.gmra.mrb[10].mxu0 %v2567_v28 }
  0x7b   : > { %2028 = vmatprep.mubr.f32.mxu1 %v2564_v23  ;;  %2109 = vmatprep.mubr.f32.mxu0 %v2569_v30 }
  0x7e   : > { %2029 = vmatmul.mubr.f32.gmra.mrb[10].mxu1 %v2579_v39  ;;  %2110 = vmatmul.mubr.f32.gmra.mrb[12].mxu0 %v2571_v31 }
  0x7f   : > { %2031 = vmatprep.mubr.f32.mxu1 %v2582_v40  ;;  %2112 = vmatprep.mubr.f32.mxu0 %v2588_v43 }
  0x82   : > { %2032 = vmatmul.mubr.f32.gmra.mrb[12].mxu1 %v2586_v42  ;;  %2113 = vmatmul.mubr.f32.gmra.mrb[14].mxu0 %v2598_v53 }
  0x83   : > { %2034 = vmatprep.mubr.f32.mxu1 %v2595_v51 }
  0x86   : > { %2035 = vmatmul.mubr.f32.gmra.mrb[14].mxu1 %v2603_v57 }
 0x139   : > { %v2093_v3 = vpop.f32.mrb[0].mxu0 }
 0x13a   : > { %v1299_v9 = vpop.f32.mrb[1].mxu0 }
 0x13d   : > { %v2015_v10 = vpop.f32.mrb[0].mxu1  ;;  %v2096_v14 = vpop.f32.mrb[2].mxu0 }
 0x13e   : > { %v2115_v15 = vadd.f32 %v2093_v3, %v2015_v10  ;;  %v764_v16 = vpop.f32.mrb[1].mxu1  ;;  %v1311_v19 = vpop.f32.mrb[3].mxu0 }
 0x13f   : > { %v2116_v20 = vadd.f32 %v1299_v9, %v764_v16 }
 0x140   : > { %1486 = vmin.xlane.f32.xlu0 %v2115_v15 }
 0x141   : > { %v2018_v21 = vpop.f32.mrb[2].mxu1  ;;  %v2099_v24 = vpop.f32.mrb[4].mxu0 }
 0x142   : > { %v2117_v25 = vadd.f32 %v2096_v14, %v2018_v21  ;;  %v778_v26 = vpop.f32.mrb[3].mxu1  ;;  %v1323_v29 = vpop.f32.mrb[5].mxu0 }
 0x143   : > { %v2118_v34 = vadd.f32 %v1311_v19, %v778_v26 }
 0x144   : > { %1484 = vmin.xlane.f32.xlu0 %v2116_v20  ;;  %1490 = vmin.xlane.f32.xlu1 %v2117_v25 }
 0x145   : > { %v2021_v38 = vpop.f32.mrb[4].mxu1  ;;  %v2102_v48 = vpop.f32.mrb[6].mxu0 }
 0x146   : > { %v2119_v58 = vadd.f32 %v2099_v24, %v2021_v38  ;;  %v792_v63 = vpop.f32.mrb[5].mxu1  ;;  %v1335_v2 = vpop.f32.mrb[7].mxu0 }
 0x147   : > { %v2120_v5 = vadd.f32 %v1323_v29, %v792_v63 }
 0x148   : > { %v1662_v6 = vmin.f32 %v2115_v15, %v2119_v58  ;;  %1488 = vmin.xlane.f32.xlu1 %v2118_v34 }
 0x149   : > { %v1661_v7 = vmin.f32 %v2116_v20, %v2120_v5  ;;  %v2105_v18 = vpop.f32.mrb[8].mxu0  ;;  %1492 = vmin.xlane.f32.xlu0 %v2120_v5  ;;  %v2024_v22 = vpop.f32.mrb[6].mxu1 }
 0x14a   : > { %v2121_v23 = vadd.f32 %v2102_v48, %v2024_v22  ;;  %v806_v27 = vpop.f32.mrb[7].mxu1  ;;  %v1347_v28 = vpop.f32.mrb[9].mxu0 }
 0x14b   : > { %v2122_v30 = vadd.f32 %v1335_v2, %v806_v27 }
 0x14c   : > { %v1664_v31 = vmin.f32 %v2117_v25, %v2121_v23  ;;  %1494 = vmin.xlane.f32.xlu1 %v2119_v58 }
 0x14d   : > { %v1663_v32 = vmin.f32 %v2118_v34, %v2122_v30  ;;  %v2108_v33 = vpop.f32.mrb[10].mxu0  ;;  %1496 = vmin.xlane.f32.xlu0 %v2122_v30  ;;  %v2027_v35 = vpop.f32.mrb[8].mxu1 }
 0x14e   : > { %v2123_v36 = vadd.f32 %v2105_v18, %v2027_v35  ;;  %v820_v37 = vpop.f32.mrb[9].mxu1  ;;  %v1359_v39 = vpop.f32.mrb[11].mxu0 }
 0x14f   : > { %v2124_v40 = vadd.f32 %v1347_v28, %v820_v37 }
 0x150   : > { %v1666_v41 = vmin.f32 %v1662_v6, %v2123_v36  ;;  %1498 = vmin.xlane.f32.xlu1 %v2121_v23 }
 0x151   : > { %v1665_v42 = vmin.f32 %v1661_v7, %v2124_v40  ;;  %v2111_v43 = vpop.f32.mrb[12].mxu0  ;;  %1500 = vmin.xlane.f32.xlu0 %v2124_v40  ;;  %v2030_v44 = vpop.f32.mrb[10].mxu1 }
 0x152   : > { %v2125_v45 = vadd.f32 %v2108_v33, %v2030_v44  ;;  %v834_v46 = vpop.f32.mrb[11].mxu1  ;;  %v1371_v47 = vpop.f32.mrb[13].mxu0 }
 0x153   : > { %v2126_v49 = vadd.f32 %v1359_v39, %v834_v46 }
 0x154   : > { %v1668_v50 = vmin.f32 %v1664_v31, %v2125_v45  ;;  %1502 = vmin.xlane.f32.xlu1 %v2123_v36 }
 0x155   : > { %v1667_v51 = vmin.f32 %v1663_v32, %v2126_v49  ;;  %v2114_v52 = vpop.f32.mrb[14].mxu0  ;;  %1504 = vmin.xlane.f32.xlu0 %v2126_v49  ;;  %v2033_v53 = vpop.f32.mrb[12].mxu1 }
 0x156   : > { %v2127_v54 = vadd.f32 %v2111_v43, %v2033_v53  ;;  %v848_v55 = vpop.f32.mrb[13].mxu1  ;;  %v1383_v56 = vpop.f32.mrb[15].mxu0 }
 0x157   : > { %v2128_v57 = vadd.f32 %v1371_v47, %v848_v55 }
 0x158   : > { %v1670_v59 = vmin.f32 %v1666_v41, %v2127_v54  ;;  %1506 = vmin.xlane.f32.xlu1 %v2125_v45 }
 0x159   : > { %v1669_v60 = vmin.f32 %v1665_v42, %v2128_v57  ;;  %1508 = vmin.xlane.f32.xlu0 %v2128_v57  ;;  %v2036_v61 = vpop.f32.mrb[14].mxu1 }
 0x15a   : > { %v2129_v62 = vadd.f32 %v2114_v52, %v2036_v61  ;;  %v862_v0 = vpop.f32.mrb[15].mxu1 }
 0x15b   : > { %v1673_v1 = vmin.f32 %v1669_v60, %v1670_v59  ;;  %v2130_v4 = vadd.f32 %v1383_v56, %v862_v0 }
 0x15c   : > { %v1672_v8 = vmin.f32 %v1668_v50, %v2129_v62  ;;  %1510 = vmin.xlane.f32.xlu1 %v2127_v54 }
 0x15d   : > { %v1671_v11 = vmin.f32 %v1667_v51, %v2130_v4  ;;  %1512 = vmin.xlane.f32.xlu0 %v2130_v4 }
 0x15f   : > { %v1674_v12 = vmin.f32 %v1671_v11, %v1672_v8 }
 0x160   : > { %1514 = vmin.xlane.f32.xlu1 %v2129_v62 }
 0x161   : > { %v1675_v13 = vmin.f32 %v1673_v1, %v1674_v12 }
 0x163   : > { %v1676_v17 = vrot.slane %v1675_v13, 4 }
 0x165   : > { %v1677_v3 = vmin.f32 %v1675_v13, %v1676_v17 }
 0x167   : > { %v1678_v9 = vrot.slane %v1677_v3, 2 }
 0x169   : > { %v1679_v10 = vmin.f32 %v1677_v3, %v1678_v9 }
 0x16b   : > { %v1680_v14 = vrot.slane %v1679_v10, 1 }
 0x16d   : > { %v1681_v15 = vmin.f32 %v1679_v10, %v1680_v14 }
 0x16f   : > { %v1682_v16 = vmax.f32 %v1681_v15, 0.0 }
 0x171   : > { %1688 = vst [vmem:[%s217_s9] sm:$0x1] %v1682_v16 }
 0x172   : > { %2268 = shalt.err (!%p2265_p5)
}
 0x173   : > { %s2269_s30 = scalar_lea.hbm %s2687_s19, 16  ;;  %s2273_s6 = scalar_lea.hbm %s2801_s3, 32 }
 0x174   : > { %p2270_p6 = scmp.ne.s32.totalorder %s2687_s19, %s2269_s30  ;;  %p2274_p10 = scmp.lt.u32.totalorder %s2687_s19, %s2801_s3 }
 0x175   : > { %p2275_p11 = scmp.lt.u32.totalorder %s2273_s6, %s2269_s30  ;;  %p2277_p13 = scmp.lt.u32.totalorder %s2269_s30, %s2687_s19 }
 0x176   : > { %p2271_p7 = pnand %p2270_p6, %p2429_p4 }
 0x177   : > { %p2276_p12 = por %p2275_p11, %p2274_p10 }
 0x178   : > { %p2272_p9 = pneg %p2271_p7 }
 0x179   : > { %p2278_p0 = por %p2277_p13, %p2276_p12 }
 0x17b   : > { %p2279_p1 = pnand %p2278_p0, %p2272_p9 }
 0x17d   : > { %2282 = shalt.err (!%p2279_p1)
}
 0x17e   : > { %2196 = dma.vmem_to_hbm [thread:$0]  (%p2429_p4), %s1729_s21, 16, %s2687_s19, %s1702_s23   ;;  %v1548_v19 = vlaneseq  ;;  %vm1559_vm1 = vcmask 130112   ;;  %vm1566_vm2 = vcmask 195712   ;;  %vm1573_vm3 = vcmask 261312  }
 0x17f   : > { %vm1580_vm4 = vcmask 326912   ;;  %vm1587_vm5 = vcmask 392512   ;;  %vm1594_vm6 = vcmask 458112   ;;  %vm1601_vm7 = vcmask 523712   ;;  %s211_s11 = scalar_lea.vmem [#allocation3], %s2678_s8  ;;  %s2750_s23 = scalar_lea.hbm %s2800_s2, %s1852_s10 }
 0x180   : > { %v2707_v20 = vand.u32 127, %v1548_v19  ;;  %v2709_v24 = vshrl.u32 %v1548_v19, 7  ;;  %vm1608_vm8 = vcmask 589312   ;;  %vm1615_vm9 = vcmask 654912   ;;  %s1715_s18 = sshll.u32 %s211_s11, 4  ;;  %s1698_s26 = scalar_lea.sflag [#allocation4], %s2678_s8  ;;  %s2752_s18 = int_to_ptr.vmem [resolvable:$true] %s1715_s18 }
 0x181   : > { %vm1622_vm10 = vcmask 720512   ;;  %vm1629_vm11 = vcmask 786112   ;;  %vm1636_vm12 = vcmask 851712   ;;  %vm1643_vm13 = vcmask 917312   ;;  %s2283_s27 = scalar_lea.vmem %s2752_s18, 16  ;;  %s2368_s28 = smov [#allocation3]  }
 0x182   : > { %v1554_v25 = vadd.s32 4294967288, %v2707_v20  ;;  %v1561_v26 = vadd.s32 4294967280, %v2707_v20  ;;  %v1552_v29 = vsub.s32 %v2707_v20, %v2709_v24  ;;  %v1568_v38 = vadd.s32 4294967272, %v2707_v20  ;;  %p2284_p2 = scmp.ne.s32.totalorder %s2752_s18, %s2283_s27  ;;  %s2287_s15 = sshll.u32 %s2368_s28, 4  ;;  %s2288_s15 = int_to_ptr.vmem [resolvable:$false] %s2287_s15 }
 0x183   : > { %v1575_v58 = vadd.s32 4294967264, %v2707_v20  ;;  %v1582_v6 = vadd.s32 4294967256, %v2707_v20  ;;  %v1589_v18 = vadd.s32 4294967248, %v2707_v20  ;;  %v1596_v40 = vadd.s32 4294967240, %v2707_v20  ;;  %s2289_s29 = scalar_lea.vmem %s2288_s15, 32  ;;  %p2290_p6 = scmp.lt.s32.totalorder %s2752_s18, %s2288_s15 }
 0x184   : > { %v1557_v2 = vsub.s32 %v1554_v25, %v2709_v24  ;;  %v1564_v7 = vsub.s32 %v1561_v26, %v2709_v24  ;;  %v1571_v23 = vsub.s32 %v1568_v38, %v2709_v24  ;;  %v1603_v45 = vadd.s32 4294967232, %v2707_v20  ;;  %p2285_p3 = pnand %p2284_p2, %p2429_p4  ;;  %p2291_p7 = scmp.lt.s32.totalorder %s2289_s29, %s2283_s27 }
 0x185   : > { %v1578_v30 = vsub.s32 %v1575_v58, %v2709_v24  ;;  %v1585_v36 = vsub.s32 %v1582_v6, %v2709_v24  ;;  %v1592_v39 = vsub.s32 %v1589_v18, %v2709_v24  ;;  %v1599_v54 = vsub.s32 %v1596_v40, %v2709_v24 }
 0x186   : > { %v1610_v55 = vadd.s32 4294967224, %v2707_v20  ;;  %v1606_v59 = vsub.s32 %v1603_v45, %v2709_v24  ;;  %v1617_v60 = vadd.s32 4294967216, %v2707_v20  ;;  %v1624_v11 = vadd.s32 4294967208, %v2707_v20  ;;  %p2286_p5 = pneg %p2285_p3  ;;  %p2292_p9 = por %p2291_p7, %p2290_p6 }
 0x187   : > { %v1631_v9 = vadd.s32 4294967200, %v2707_v20  ;;  %v1638_v25 = vadd.s32 4294967192, %v2707_v20  ;;  %v1652_v18 = vadd.s32 4294967176, %v2707_v20  ;;  %vm1650_vm14 = vcmask 982912  }
 0x188   : > { %v1613_v8 = vsub.s32 %v1610_v55, %v2709_v24  ;;  %v1620_v3 = vsub.s32 %v1617_v60, %v2709_v24  ;;  %vm1657_vm15 = vcmask 1048512   ;;  %p2293_p10 = pnand %p2292_p9, %p2286_p5 }
 0x189   : > { %v1634_v38 = vsub.s32 %v1631_v9, %v2709_v24 }
 0x1cd   : > { %v1487_v21 = vpop.xlane.xlu0 %1486 }
 0x1ce   : > { %v1517_v5 = vmax.f32 %v1487_v21, 0.0  ;;  %v1627_v21 = vsub.s32 %v1624_v11, %v2709_v24 }
 0x1d0   : > { %v1558_v33 = vrot.slane %v1517_v5, %v1557_v2 }
 0x1d1   : > { %v1485_v34 = vpop.xlane.xlu0 %1484  ;;  %v1491_v48 = vpop.xlane.xlu1 %1490 }
 0x1d2   : > { %v1516_v63 = vmax.f32 %v1485_v34, 0.0  ;;  %v1519_v27 = vmax.f32 %v1491_v48, 0.0  ;;  %v1645_v48 = vadd.s32 4294967184, %v2707_v20 }
 0x1d4   : > { %v1553_v22 = vrot.slane %v1516_v63, %v1552_v29  ;;  %v1572_v42 = vrot.slane %v1519_v27, %v1571_v23 }
 0x1d5   : > { %v1489_v28 = vpop.xlane.xlu1 %1488 }
 0x1d6   : > { %v1518_v31 = vmax.f32 %v1489_v28, 0.0  ;;  %v1493_v32 = vpop.xlane.xlu0 %1492  ;;  %v1560_v41 = vsel %vm1559_vm1, %v1558_v33, %v1553_v22  ;;  %v1648_v28 = vsub.s32 %v1645_v48, %v2709_v24 }
 0x1d7   : > { %v1520_v35 = vmax.f32 %v1493_v32, 0.0 }
 0x1d8   : > { %v1565_v37 = vrot.slane %v1518_v31, %v1564_v7  ;;  %v1641_v7 = vsub.s32 %v1638_v25, %v2709_v24 }
 0x1d9   : > { %v1579_v43 = vrot.slane %v1520_v35, %v1578_v30  ;;  %v1495_v44 = vpop.xlane.xlu1 %1494 }
 0x1da   : > { %v1567_v46 = vsel %vm1566_vm2, %v1565_v37, %v1560_v41  ;;  %v1521_v47 = vmax.f32 %v1495_v44, 0.0  ;;  %v1497_v49 = vpop.xlane.xlu0 %1496 }
 0x1db   : > { %v1574_v50 = vsel %vm1573_vm3, %v1572_v42, %v1567_v46  ;;  %v1522_v51 = vmax.f32 %v1497_v49, 0.0 }
 0x1dc   : > { %v1581_v52 = vsel %vm1580_vm4, %v1579_v43, %v1574_v50  ;;  %v1586_v53 = vrot.slane %v1521_v47, %v1585_v36  ;;  %v1655_v36 = vsub.s32 %v1652_v18, %v2709_v24 }
 0x1dd   : > { %v1593_v56 = vrot.slane %v1522_v51, %v1592_v39  ;;  %v1499_v57 = vpop.xlane.xlu1 %1498 }
 0x1de   : > { %v1588_v61 = vsel %vm1587_vm5, %v1586_v53, %v1581_v52  ;;  %v1523_v62 = vmax.f32 %v1499_v57, 0.0  ;;  %v1501_v0 = vpop.xlane.xlu0 %1500 }
 0x1df   : > { %v1524_v1 = vmax.f32 %v1501_v0, 0.0  ;;  %v1595_v12 = vsel %vm1594_vm6, %v1593_v56, %v1588_v61 }
 0x1e0   : > { %v1600_v4 = vrot.slane %v1523_v62, %v1599_v54 }
 0x1e1   : > { %v1607_v13 = vrot.slane %v1524_v1, %v1606_v59  ;;  %v1503_v17 = vpop.xlane.xlu1 %1502 }
 0x1e2   : > { %v1602_v10 = vsel %vm1601_vm7, %v1600_v4, %v1595_v12  ;;  %v1525_v14 = vmax.f32 %v1503_v17, 0.0  ;;  %v1505_v15 = vpop.xlane.xlu0 %1504 }
 0x1e3   : > { %v1526_v16 = vmax.f32 %v1505_v15, 0.0  ;;  %v1609_v26 = vsel %vm1608_vm8, %v1607_v13, %v1602_v10 }
 0x1e4   : > { %v1614_v19 = vrot.slane %v1525_v14, %v1613_v8 }
 0x1e5   : > { %v1621_v29 = vrot.slane %v1526_v16, %v1620_v3  ;;  %v1507_v34 = vpop.xlane.xlu1 %1506 }
 0x1e6   : > { %v1616_v58 = vsel %vm1615_vm9, %v1614_v19, %v1609_v26  ;;  %v1527_v63 = vmax.f32 %v1507_v34, 0.0  ;;  %v1509_v2 = vpop.xlane.xlu0 %1508 }
 0x1e7   : > { %v1528_v5 = vmax.f32 %v1509_v2, 0.0  ;;  %v1623_v22 = vsel %vm1622_vm10, %v1621_v29, %v1616_v58 }
 0x1e8   : > { %v1628_v6 = vrot.slane %v1527_v63, %v1627_v21 }
 0x1e9   : > { %v1635_v23 = vrot.slane %v1528_v5, %v1634_v38  ;;  %v1511_v27 = vpop.xlane.xlu1 %1510 }
 0x1ea   : > { %v1630_v30 = vsel %vm1629_vm11, %v1628_v6, %v1623_v22  ;;  %v1529_v31 = vmax.f32 %v1511_v27, 0.0  ;;  %v1513_v32 = vpop.xlane.xlu0 %1512 }
 0x1eb   : > { %v1530_v33 = vmax.f32 %v1513_v32, 0.0  ;;  %v1637_v37 = vsel %vm1636_vm12, %v1635_v23, %v1630_v30 }
 0x1ec   : > { %v1642_v35 = vrot.slane %v1529_v31, %v1641_v7 }
 0x1ed   : > { %v1649_v39 = vrot.slane %v1530_v33, %v1648_v28  ;;  %v1515_v20 = vpop.xlane.xlu1 %1514 }
 0x1ee   : > { %v1644_v40 = vsel %vm1643_vm13, %v1642_v35, %v1637_v37  ;;  %v1531_v41 = vmax.f32 %v1515_v20, 0.0 }
 0x1ef   : > { %v1651_v43 = vsel %vm1650_vm14, %v1649_v39, %v1644_v40 }
 0x1f0   : > { %v1656_v42 = vrot.slane %v1531_v41, %v1655_v36 }
 0x1f2   : > { %v1658_v24 = vsel %vm1657_vm15, %v1656_v42, %v1651_v43 }
 0x1f3   : > { %1660 = vst [vmem:[%s211_s11] sm:$0x1] %v1658_v24 }
 0x1f4   : > { %2296 = shalt.err (!%p2293_p10)
}
 0x1f5   : > { %s2297_s8 = scalar_lea.hbm %s2750_s23, 16  ;;  %s2301_s4 = scalar_lea.hbm %s2800_s2, 32 }
 0x1f6   : > { %p2298_p11 = scmp.ne.s32.totalorder %s2750_s23, %s2297_s8  ;;  %p2302_p0 = scmp.lt.u32.totalorder %s2750_s23, %s2800_s2 }
 0x1f7   : > { %p2303_p1 = scmp.lt.u32.totalorder %s2301_s4, %s2297_s8  ;;  %p2305_p3 = scmp.lt.u32.totalorder %s2297_s8, %s2750_s23 }
 0x1f8   : > { %p2299_p12 = pnand %p2298_p11, %p2429_p4 }
 0x1f9   : > { %p2304_p2 = por %p2303_p1, %p2302_p0 }
 0x1fa   : > { %p2300_p13 = pneg %p2299_p12 }
 0x1fb   : > { %p2306_p5 = por %p2305_p3, %p2304_p2 }
 0x1fd   : > { %p2307_p6 = pnand %p2306_p5, %p2300_p13 }
 0x1ff   : > { %2310 = shalt.err (!%p2307_p6)
}
 0x200   : > { %2195 = dma.vmem_to_hbm [thread:$0]  (%p2429_p4), %s2752_s18, 16, %s2750_s23, %s1698_s26  }
 0x201 PF: > { %p2206_p7 = scmp.ge.s32.totalorder %s2365_s17, 2  ;;  %s1740_s7 = sand.u32 1, %s2345_s12  }
 0x202   : > { %s1741_s9 = scalar_lea.sflag [#allocation4], %s1740_s7 }
 0x203   : > { %p2200_p9 = pnand %p2206_p7, %p2436_p8 }
 0x205   : > { %2336 = dma.done.wait (!%p2200_p9), %s1741_s9, 16  }
 0x206   : > { %2338 = vsyncadd (!%p2200_p9), %s1741_s9, 4294967280  ;;  %s1749_s11 = scalar_lea.sflag [#allocation6], %s1740_s7 }
 0x207   : > { %2340 = dma.done.wait (!%p2200_p9), %s1749_s11, 16  }
 0x208   : > { %2342 = vsyncadd (!%p2200_p9), %s1749_s11, 4294967280  ;;  %s20_s17 = sadd.s32 1, %s2365_s17   ;;  %s2804_s12 = smov %s2349_s13 }
 0x209   : > { %p17_p10 = scmp.ge.s32.totalorder %s20_s17, 4   ;;  %s2805_s13 = smov %s2353_s14 }
 0x20a   : > { %s2806_s14 = smov %s2442_s25  ;;  %s2807_s15 = smov %s2361_s16 }
 0x20b   : > { %s2808_s16 = smov %s2810_s20  ;;  %19 = sbr.rel (!%p17_p10) target bundleno = 6 (0x6), region = 106 }
 0x212   :  { %1753 = vsyncpa [#allocation4], 1 }
 0x213   :  { %1755 = vsyncpa [#allocation4 + $0x1], 1 }
 0x214   :  { %1756 = vsyncpa [#allocation6], 1 }
 0x215   :  { %1758 = vsyncpa [#allocation6 + $0x1], 1 }

</bundles_post_ra>
